<compile_context>
chip_gen: v6e
topology: v6e:2x2x1
jax: 0.10.0
libtpu: 0.0.40
codegen_flags: <defaults>
</compile_context>

<pallas_src>
import functools

import jax
import jax.numpy as jnp
from jax.experimental import pallas as pl
from jax.experimental.pallas import tpu as pltpu


# ---------------------------------------------------------------------------
# CubeSpherePadding2D(1)  (plain-JAX glue: gathers across cube faces)
# ---------------------------------------------------------------------------
def _cube_sphere_pad(x):
    """Pad each of the 6 cube faces by 1 pixel using neighbouring faces.
    x: (B, C, 6, H, W) -> (B, C, 6, H+2, W+2)
    """
    # TODO(synk): the original CubeSpherePadding2D source was not provided; a
    # self-consistent cube topology is used (faces 0-3 equatorial band,
    # 4 = north pole, 5 = south pole) and the 4 degenerate corner pixels are
    # filled with the mean of their two neighbouring halo values.
    B, C, F, H, W = x.shape
    assert F == 6 and H == W, "cube-sphere faces must be square, F must be 6"
    f = [x[:, :, i] for i in range(6)]  # each (B, C, H, W)
    f0, f1, f2, f3, f4, f5 = f

    top = [f4[..., -1, :], f4[..., ::-1, -1], f4[..., 0, ::-1], f4[..., :, 0],
           f2[..., 0, ::-1], f0[..., -1, :]]
    bot = [f5[..., 0, :], f5[..., :, -1], f5[..., -1, ::-1], f5[..., ::-1, 0],
           f0[..., 0, :], f2[..., -1, ::-1]]
    lef = [f3[..., :, -1], f0[..., :, -1], f1[..., :, -1], f2[..., :, -1],
           f3[..., 0, :], f3[..., -1, ::-1]]
    rig = [f1[..., :, 0], f2[..., :, 0], f3[..., :, 0], f0[..., :, 0],
           f1[..., 0, ::-1], f1[..., -1, :]]

    padded = []
    for i in range(6):
        face, t, b_, l, r = f[i], top[i], bot[i], lef[i], rig[i]
        mid = jnp.concatenate([l[..., :, None], face, r[..., :, None]], axis=-1)
        tl = 0.5 * (t[..., :1] + l[..., :1])
        tr = 0.5 * (t[..., -1:] + r[..., :1])
        bl = 0.5 * (b_[..., :1] + l[..., -1:])
        br = 0.5 * (b_[..., -1:] + r[..., -1:])
        trow = jnp.concatenate([tl, t, tr], axis=-1)[..., None, :]
        brow = jnp.concatenate([bl, b_, br], axis=-1)[..., None, :]
        padded.append(jnp.concatenate([trow, mid, brow], axis=-2))
    return jnp.stack(padded, axis=2)  # (B, C, 6, H+2, W+2)


# ---------------------------------------------------------------------------
# Pallas kernel: in-kernel im2col (shifted flat slices) -> 9 accumulating MXU
# matmuls + bias + scalar PReLU, per (face-group, batch) block.
# ---------------------------------------------------------------------------
def _conv3x3_bias_prelu_kernel(wtype_ref, x_ref, w_ref, b_ref, alpha_ref, o_ref,
                               *, width, out_len):
    # wtype_ref : (3,) SMEM       face-group -> weight-set table (index_maps only)
    # x_ref     : (1, 1, C, S)    halo-padded pair of faces, spatial flat on lanes
    # w_ref     : (1, 9, Cout, C) conv weights for this weight set, tap-major
    # b_ref     : (1, Cout, 1)    bias
    # alpha_ref : (1, 1) SMEM     scalar PReLU slope
    # o_ref     : (1, 1, Cout, L) conv output in padded-flat coordinates
    del wtype_ref                                   # consumed only by index_maps
    wp2 = width + 2
    # out[:, q] = sum_{dh,dw} W[dh,dw] @ x[:, q + dh*(W+2) + dw]
    acc = jnp.dot(w_ref[0, 0], x_ref[0, 0, :, 0:out_len],
                  preferred_element_type=jnp.float32)
    for k in range(1, 9):
        dh, dw = k // 3, k % 3
        st = dh * wp2 + dw                          # static shift, stays in-face
        acc = acc + jnp.dot(w_ref[0, k], x_ref[0, 0, :, st:st + out_len],
                            preferred_element_type=jnp.float32)
    acc = acc + b_ref[0]                            # (Cout, 1) broadcast over N
    a = alpha_ref[0, 0]
    acc = jnp.where(acc >= 0.0, acc, a * acc)       # scalar PReLU (== post-shuffle)
    o_ref[0, 0] = acc.astype(o_ref.dtype)


def upsample_block_forward(x, w_eq, b_eq, w_po, b_po, alpha):
    """Forward pass of UpsampleBlock.  x: (B, C, 6, H, W) -> (B, C, 6, 2H, 2W)."""
    B, C, F, H, W = x.shape
    Cout = w_eq.shape[0]                     # = 4 * C
    P = (H + 2) * (W + 2)                    # flattened padded face
    S = 2 * P + 2                            # two faces + 2 cols so rows reshape cleanly
    L = 2 * (H + 1) * (W + 2)                # per-group output length (incl. halo cols)

    # --- glue: cube-sphere halo pad, pair faces per shared-weight group -----
    xp = _cube_sphere_pad(x)                               # (B, C, 6, H+2, W+2)
    xf = xp.reshape(B, C, 6, P)
    xf = jnp.moveaxis(xf, 2, 0)                            # (6, B, C, P)
    xf = xf.reshape(3, 2, B, C, P)                         # groups (0,1),(2,3),(4,5)
    xf = jnp.moveaxis(xf, 1, 3)                            # (3, B, C, 2, P)
    xf = xf.reshape(3, B, C, 2 * P)
    xf = jnp.pad(xf, ((0, 0), (0, 0), (0, 0), (0, 2)))     # (3, B, C, S)

    # TODO(synk): CubeSphereConv2D source not provided; DLWP-CS-style weight
    # sharing is assumed (one kernel for the 4 equatorial faces, one for the
    # 2 polar faces). If the original uses a single shared kernel, pass w_po=w_eq.
    def to_taps(w):  # (Cout, C, 3, 3) -> (9, Cout, C), tap index = dh*3+dw
        return jnp.transpose(w, (2, 3, 0, 1)).reshape(9, Cout, C)

    w_all = jnp.stack([to_taps(w_eq), to_taps(w_po)], axis=0)   # (2, 9, Cout, C)
    b_all = jnp.stack([b_eq, b_po], axis=0)[..., None]          # (2, Cout, 1)
    alpha2d = jnp.reshape(alpha, (1, 1)).astype(jnp.float32)
    wtype = jnp.array([0, 0, 1], dtype=jnp.int32)               # group -> weight set

    kernel = functools.partial(_conv3x3_bias_prelu_kernel, width=W, out_len=L)

    out = pl.pallas_call(
        kernel,
        out_shape=jax.ShapeDtypeStruct((3, B, Cout, L), jnp.float32),
        grid_spec=pltpu.PrefetchScalarGridSpec(
            num_scalar_prefetch=1,
            grid=(3, B),   # outer: face group (weight block constant along inner axis)
            in_specs=[
                pl.BlockSpec((1, 1, C, S), lambda g, b, wt: (g, b, 0, 0)),
                pl.BlockSpec((1, 9, Cout, C), lambda g, b, wt: (wt[g], 0, 0, 0)),
                pl.BlockSpec((1, Cout, 1), lambda g, b, wt: (wt[g], 0, 0)),
                pl.BlockSpec(memory_space=pltpu.MemorySpace.SMEM),
            ],
            out_specs=pl.BlockSpec((1, 1, Cout, L), lambda g, b, wt: (g, b, 0, 0)),
        ),
        # TODO(synk): at production sizes (large C/H) add a lane-tile grid axis over
        # the flat-spatial dim and set vmem_limit_bytes per generation (<=64MiB v7x);
        # at these shapes the default scoped VMEM is ample.
        compiler_params=pltpu.CompilerParams(
            dimension_semantics=("arbitrary", "parallel")),
    )(wtype, xf, w_all, b_all, alpha2d)

    # --- glue: drop halo/junk columns, PixelShuffle(2), permute back --------
    o = out.reshape(3, B, Cout, 2 * H + 2, W + 2)
    conv = jnp.stack(
        [o[:, :, :, 0:H, 0:W], o[:, :, :, H + 2:2 * H + 2, 0:W]], axis=1
    ).reshape(6, B, Cout, H, W)                            # per-face conv output

    Cps = Cout // 4
    t = conv.reshape(6, B, Cps, 2, 2, H, W)
    t = t.transpose(0, 1, 2, 5, 3, 6, 4)                   # (6,B,Cps,H,2,W,2)
    t = t.reshape(6, B, Cps, 2 * H, 2 * W)                 # PixelShuffle(2)
    return t.transpose(1, 2, 0, 3, 4)                      # (B, C, 6, 2H, 2W)


# ---------------------------------------------------------------------------
# Pure-JAX reference (lax.conv) for a correctness check of the kernel path
# ---------------------------------------------------------------------------
def reference_forward(x, w_eq, b_eq, w_po, b_po, alpha):
    B, C, F, H, W = x.shape
    xp = _cube_sphere_pad(x)
    outs = []
    for fi in range(6):
        w = w_eq if fi < 4 else w_po
        b = b_eq if fi < 4 else b_po
        o = jax.lax.conv_general_dilated(
            xp[:, :, fi], w, (1, 1), "VALID",
            dimension_numbers=("NCHW", "OIHW", "NCHW"))
        outs.append(o + b[None, :, None, None])
    out1 = jnp.stack(outs, axis=2)                      # (B, 4C, 6, H, W)
    t = jnp.transpose(out1, (0, 2, 1, 3, 4))            # (B, 6, 4C, H, W)
    ps = t.reshape(B, F, C, 2, 2, H, W).transpose(0, 1, 2, 5, 3, 6, 4)
    ps = ps.reshape(B, F, C, 2 * H, 2 * W)
    ps = jnp.where(ps >= 0, ps, alpha * ps)             # PReLU
    return jnp.transpose(ps, (0, 2, 1, 3, 4))           # (B, C, 6, 2H, 2W)


if __name__ == "__main__":
    B, C, F, H, W = 2, 4, 6, 16, 16
    Cout = 4 * C

    key = jax.random.PRNGKey(0)
    kx, k1, k2, k3, k4 = jax.random.split(key, 5)
    x = jax.random.normal(kx, (B, C, F, H, W), dtype=jnp.float32)
    w_eq = jax.random.uniform(k1, (Cout, C, 3, 3), minval=-0.1, maxval=0.1,
                              dtype=jnp.float32)
    b_eq = jax.random.uniform(k2, (Cout,), minval=-0.1, maxval=0.1,
                              dtype=jnp.float32)
    w_po = jax.random.uniform(k3, (Cout, C, 3, 3), minval=-0.1, maxval=0.1,
                              dtype=jnp.float32)
    b_po = jax.random.uniform(k4, (Cout,), minval=-0.1, maxval=0.1,
                              dtype=jnp.float32)
    alpha = jnp.float32(0.25)  # nn.PReLU() default init

    y = jax.jit(upsample_block_forward)(x, w_eq, b_eq, w_po, b_po, alpha)
    y = jax.block_until_ready(y)
    assert y.shape == (B, C, F, 2 * H, 2 * W), y.shape

    y_ref = reference_forward(x, w_eq, b_eq, w_po, b_po, alpha)
    assert jnp.allclose(y, y_ref, atol=2e-2, rtol=2e-2), "kernel mismatch vs reference"

    print("KERNEL_OK")
</pallas_src>

<mosaic_0001>
module attributes {stable_mosaic.version = 11 : i64} {
  func.func @_conv3x3_bias_prelu_kernel(%arg0: i32, %arg1: i32, %arg2: memref<3xi32, #tpu.memory_space<smem>>, %arg3: memref<1x1x4x650xf32, #tpu.memory_space<vmem>>, %arg4: memref<1x9x16x4xf32, #tpu.memory_space<vmem>>, %arg5: memref<1x16x1xf32, #tpu.memory_space<vmem>>, %arg6: memref<1x1xf32, #tpu.memory_space<smem>>, %arg7: memref<1x1x16x612xf32, #tpu.memory_space<vmem>>) attributes {dimension_semantics = [#tpu.dimension_semantics<arbitrary>, #tpu.dimension_semantics<parallel>], iteration_bounds = array<i64: 3, 2>, scalar_prefetch = 1 : i64, scratch_operands = 0 : i64, tpu.core_type = #tpu.core_type<tc>, window_params = [{transform_indices = @transform_0, window_bounds = array<i64: 1, 1, 4, 650>}, {transform_indices = @transform_1, window_bounds = array<i64: 1, 9, 16, 4>}, {transform_indices = @transform_2, window_bounds = array<i64: 1, 16, 1>}, {transform_indices = @transform_3, window_bounds = array<i64: 1, 1>}, {transform_indices = @transform_4, window_bounds = array<i64: 1, 1, 16, 612>}]} {
    %c0 = arith.constant 0 : index
    %c0_0 = arith.constant 0 : index
    %c0_1 = arith.constant 0 : index
    %c0_2 = arith.constant 0 : index
    %0 = vector.load %arg4[%c0, %c0_0, %c0_1, %c0_2] : memref<1x9x16x4xf32, #tpu.memory_space<vmem>>, vector<1x1x16x4xf32>
    %1 = vector.shape_cast %0 : vector<1x1x16x4xf32> to vector<16x4xf32>
    %c0_3 = arith.constant 0 : index
    %c0_4 = arith.constant 0 : index
    %c0_5 = arith.constant 0 : index
    %c0_6 = arith.constant 0 : index
    %2 = vector.load %arg3[%c0_3, %c0_4, %c0_5, %c0_6] : memref<1x1x4x650xf32, #tpu.memory_space<vmem>>, vector<1x1x4x612xf32>
    %3 = vector.shape_cast %2 : vector<1x1x4x612xf32> to vector<4x612xf32>
    %cst = arith.constant dense<0.000000e+00> : vector<16x612xf32>
    %4 = tpu.matmul %1, %3, %cst {dimension_numbers = #tpu.dot_dimension_numbers<[1], [0], [0], [1], [0, 0, 1, 1], [], []>} : vector<16x4xf32>, vector<4x612xf32>, vector<16x612xf32> -> vector<16x612xf32>
    %c0_7 = arith.constant 0 : index
    %c1 = arith.constant 1 : index
    %c0_8 = arith.constant 0 : index
    %c0_9 = arith.constant 0 : index
    %5 = vector.load %arg4[%c0_7, %c1, %c0_8, %c0_9] : memref<1x9x16x4xf32, #tpu.memory_space<vmem>>, vector<1x1x16x4xf32>
    %6 = vector.shape_cast %5 : vector<1x1x16x4xf32> to vector<16x4xf32>
    %c0_10 = arith.constant 0 : index
    %c0_11 = arith.constant 0 : index
    %c0_12 = arith.constant 0 : index
    %c1_13 = arith.constant 1 : index
    %7 = vector.load %arg3[%c0_10, %c0_11, %c0_12, %c1_13] : memref<1x1x4x650xf32, #tpu.memory_space<vmem>>, vector<1x1x4x612xf32>
    %8 = vector.shape_cast %7 : vector<1x1x4x612xf32> to vector<4x612xf32>
    %cst_14 = arith.constant dense<0.000000e+00> : vector<16x612xf32>
    %9 = tpu.matmul %6, %8, %cst_14 {dimension_numbers = #tpu.dot_dimension_numbers<[1], [0], [0], [1], [0, 0, 1, 1], [], []>} : vector<16x4xf32>, vector<4x612xf32>, vector<16x612xf32> -> vector<16x612xf32>
    %10 = arith.addf %4, %9 : vector<16x612xf32>
    %c0_15 = arith.constant 0 : index
    %c2 = arith.constant 2 : index
    %c0_16 = arith.constant 0 : index
    %c0_17 = arith.constant 0 : index
    %11 = vector.load %arg4[%c0_15, %c2, %c0_16, %c0_17] : memref<1x9x16x4xf32, #tpu.memory_space<vmem>>, vector<1x1x16x4xf32>
    %12 = vector.shape_cast %11 : vector<1x1x16x4xf32> to vector<16x4xf32>
    %c0_18 = arith.constant 0 : index
    %c0_19 = arith.constant 0 : index
    %c0_20 = arith.constant 0 : index
    %c2_21 = arith.constant 2 : index
    %13 = vector.load %arg3[%c0_18, %c0_19, %c0_20, %c2_21] : memref<1x1x4x650xf32, #tpu.memory_space<vmem>>, vector<1x1x4x612xf32>
    %14 = vector.shape_cast %13 : vector<1x1x4x612xf32> to vector<4x612xf32>
    %cst_22 = arith.constant dense<0.000000e+00> : vector<16x612xf32>
    %15 = tpu.matmul %12, %14, %cst_22 {dimension_numbers = #tpu.dot_dimension_numbers<[1], [0], [0], [1], [0, 0, 1, 1], [], []>} : vector<16x4xf32>, vector<4x612xf32>, vector<16x612xf32> -> vector<16x612xf32>
    %16 = arith.addf %10, %15 : vector<16x612xf32>
    %c0_23 = arith.constant 0 : index
    %c3 = arith.constant 3 : index
    %c0_24 = arith.constant 0 : index
    %c0_25 = arith.constant 0 : index
    %17 = vector.load %arg4[%c0_23, %c3, %c0_24, %c0_25] : memref<1x9x16x4xf32, #tpu.memory_space<vmem>>, vector<1x1x16x4xf32>
    %18 = vector.shape_cast %17 : vector<1x1x16x4xf32> to vector<16x4xf32>
    %c0_26 = arith.constant 0 : index
    %c0_27 = arith.constant 0 : index
    %c0_28 = arith.constant 0 : index
    %c18 = arith.constant 18 : index
    %19 = vector.load %arg3[%c0_26, %c0_27, %c0_28, %c18] : memref<1x1x4x650xf32, #tpu.memory_space<vmem>>, vector<1x1x4x612xf32>
    %20 = vector.shape_cast %19 : vector<1x1x4x612xf32> to vector<4x612xf32>
    %cst_29 = arith.constant dense<0.000000e+00> : vector<16x612xf32>
    %21 = tpu.matmul %18, %20, %cst_29 {dimension_numbers = #tpu.dot_dimension_numbers<[1], [0], [0], [1], [0, 0, 1, 1], [], []>} : vector<16x4xf32>, vector<4x612xf32>, vector<16x612xf32> -> vector<16x612xf32>
    %22 = arith.addf %16, %21 : vector<16x612xf32>
    %c0_30 = arith.constant 0 : index
    %c4 = arith.constant 4 : index
    %c0_31 = arith.constant 0 : index
    %c0_32 = arith.constant 0 : index
    %23 = vector.load %arg4[%c0_30, %c4, %c0_31, %c0_32] : memref<1x9x16x4xf32, #tpu.memory_space<vmem>>, vector<1x1x16x4xf32>
    %24 = vector.shape_cast %23 : vector<1x1x16x4xf32> to vector<16x4xf32>
    %c0_33 = arith.constant 0 : index
    %c0_34 = arith.constant 0 : index
    %c0_35 = arith.constant 0 : index
    %c19 = arith.constant 19 : index
    %25 = vector.load %arg3[%c0_33, %c0_34, %c0_35, %c19] : memref<1x1x4x650xf32, #tpu.memory_space<vmem>>, vector<1x1x4x612xf32>
    %26 = vector.shape_cast %25 : vector<1x1x4x612xf32> to vector<4x612xf32>
    %cst_36 = arith.constant dense<0.000000e+00> : vector<16x612xf32>
    %27 = tpu.matmul %24, %26, %cst_36 {dimension_numbers = #tpu.dot_dimension_numbers<[1], [0], [0], [1], [0, 0, 1, 1], [], []>} : vector<16x4xf32>, vector<4x612xf32>, vector<16x612xf32> -> vector<16x612xf32>
    %28 = arith.addf %22, %27 : vector<16x612xf32>
    %c0_37 = arith.constant 0 : index
    %c5 = arith.constant 5 : index
    %c0_38 = arith.constant 0 : index
    %c0_39 = arith.constant 0 : index
    %29 = vector.load %arg4[%c0_37, %c5, %c0_38, %c0_39] : memref<1x9x16x4xf32, #tpu.memory_space<vmem>>, vector<1x1x16x4xf32>
    %30 = vector.shape_cast %29 : vector<1x1x16x4xf32> to vector<16x4xf32>
    %c0_40 = arith.constant 0 : index
    %c0_41 = arith.constant 0 : index
    %c0_42 = arith.constant 0 : index
    %c20 = arith.constant 20 : index
    %31 = vector.load %arg3[%c0_40, %c0_41, %c0_42, %c20] : memref<1x1x4x650xf32, #tpu.memory_space<vmem>>, vector<1x1x4x612xf32>
    %32 = vector.shape_cast %31 : vector<1x1x4x612xf32> to vector<4x612xf32>
    %cst_43 = arith.constant dense<0.000000e+00> : vector<16x612xf32>
    %33 = tpu.matmul %30, %32, %cst_43 {dimension_numbers = #tpu.dot_dimension_numbers<[1], [0], [0], [1], [0, 0, 1, 1], [], []>} : vector<16x4xf32>, vector<4x612xf32>, vector<16x612xf32> -> vector<16x612xf32>
    %34 = arith.addf %28, %33 : vector<16x612xf32>
    %c0_44 = arith.constant 0 : index
    %c6 = arith.constant 6 : index
    %c0_45 = arith.constant 0 : index
    %c0_46 = arith.constant 0 : index
    %35 = vector.load %arg4[%c0_44, %c6, %c0_45, %c0_46] : memref<1x9x16x4xf32, #tpu.memory_space<vmem>>, vector<1x1x16x4xf32>
    %36 = vector.shape_cast %35 : vector<1x1x16x4xf32> to vector<16x4xf32>
    %c0_47 = arith.constant 0 : index
    %c0_48 = arith.constant 0 : index
    %c0_49 = arith.constant 0 : index
    %c36 = arith.constant 36 : index
    %37 = vector.load %arg3[%c0_47, %c0_48, %c0_49, %c36] : memref<1x1x4x650xf32, #tpu.memory_space<vmem>>, vector<1x1x4x612xf32>
    %38 = vector.shape_cast %37 : vector<1x1x4x612xf32> to vector<4x612xf32>
    %cst_50 = arith.constant dense<0.000000e+00> : vector<16x612xf32>
    %39 = tpu.matmul %36, %38, %cst_50 {dimension_numbers = #tpu.dot_dimension_numbers<[1], [0], [0], [1], [0, 0, 1, 1], [], []>} : vector<16x4xf32>, vector<4x612xf32>, vector<16x612xf32> -> vector<16x612xf32>
    %40 = arith.addf %34, %39 : vector<16x612xf32>
    %c0_51 = arith.constant 0 : index
    %c7 = arith.constant 7 : index
    %c0_52 = arith.constant 0 : index
    %c0_53 = arith.constant 0 : index
    %41 = vector.load %arg4[%c0_51, %c7, %c0_52, %c0_53] : memref<1x9x16x4xf32, #tpu.memory_space<vmem>>, vector<1x1x16x4xf32>
    %42 = vector.shape_cast %41 : vector<1x1x16x4xf32> to vector<16x4xf32>
    %c0_54 = arith.constant 0 : index
    %c0_55 = arith.constant 0 : index
    %c0_56 = arith.constant 0 : index
    %c37 = arith.constant 37 : index
    %43 = vector.load %arg3[%c0_54, %c0_55, %c0_56, %c37] : memref<1x1x4x650xf32, #tpu.memory_space<vmem>>, vector<1x1x4x612xf32>
    %44 = vector.shape_cast %43 : vector<1x1x4x612xf32> to vector<4x612xf32>
    %cst_57 = arith.constant dense<0.000000e+00> : vector<16x612xf32>
    %45 = tpu.matmul %42, %44, %cst_57 {dimension_numbers = #tpu.dot_dimension_numbers<[1], [0], [0], [1], [0, 0, 1, 1], [], []>} : vector<16x4xf32>, vector<4x612xf32>, vector<16x612xf32> -> vector<16x612xf32>
    %46 = arith.addf %40, %45 : vector<16x612xf32>
    %c0_58 = arith.constant 0 : index
    %c8 = arith.constant 8 : index
    %c0_59 = arith.constant 0 : index
    %c0_60 = arith.constant 0 : index
    %47 = vector.load %arg4[%c0_58, %c8, %c0_59, %c0_60] : memref<1x9x16x4xf32, #tpu.memory_space<vmem>>, vector<1x1x16x4xf32>
    %48 = vector.shape_cast %47 : vector<1x1x16x4xf32> to vector<16x4xf32>
    %c0_61 = arith.constant 0 : index
    %c0_62 = arith.constant 0 : index
    %c0_63 = arith.constant 0 : index
    %c38 = arith.constant 38 : index
    %49 = vector.load %arg3[%c0_61, %c0_62, %c0_63, %c38] : memref<1x1x4x650xf32, #tpu.memory_space<vmem>>, vector<1x1x4x612xf32>
    %50 = vector.shape_cast %49 : vector<1x1x4x612xf32> to vector<4x612xf32>
    %cst_64 = arith.constant dense<0.000000e+00> : vector<16x612xf32>
    %51 = tpu.matmul %48, %50, %cst_64 {dimension_numbers = #tpu.dot_dimension_numbers<[1], [0], [0], [1], [0, 0, 1, 1], [], []>} : vector<16x4xf32>, vector<4x612xf32>, vector<16x612xf32> -> vector<16x612xf32>
    %52 = arith.addf %46, %51 : vector<16x612xf32>
    %c0_65 = arith.constant 0 : index
    %c0_66 = arith.constant 0 : index
    %c0_67 = arith.constant 0 : index
    %53 = vector.load %arg5[%c0_65, %c0_66, %c0_67] : memref<1x16x1xf32, #tpu.memory_space<vmem>>, vector<1x16x1xf32>
    %54 = vector.shape_cast %53 : vector<1x16x1xf32> to vector<16x1xf32>
    %55 = vector.broadcast %54 : vector<16x1xf32> to vector<16x612xf32>
    %56 = arith.addf %52, %55 : vector<16x612xf32>
    %c0_68 = arith.constant 0 : index
    %c0_69 = arith.constant 0 : index
    %57 = memref.load %arg6[%c0_68, %c0_69] : memref<1x1xf32, #tpu.memory_space<smem>>
    %cst_70 = arith.constant 0.000000e+00 : f32
    %58 = vector.broadcast %cst_70 : f32 to vector<16x612xf32>
    %59 = arith.cmpf oge, %56, %58 : vector<16x612xf32>
    %60 = vector.broadcast %57 : f32 to vector<16x612xf32>
    %61 = arith.mulf %60, %56 : vector<16x612xf32>
    %62 = arith.select %59, %56, %61 : vector<16x612xi1>, vector<16x612xf32>
    %c0_71 = arith.constant 0 : index
    %c0_72 = arith.constant 0 : index
    %c0_73 = arith.constant 0 : index
    %c0_74 = arith.constant 0 : index
    %63 = vector.load %arg7[%c0_71, %c0_72, %c0_73, %c0_74] : memref<1x1x16x612xf32, #tpu.memory_space<vmem>>, vector<1x1x16x612xf32>
    %64 = vector.shape_cast %63 : vector<1x1x16x612xf32> to vector<16x612xf32>
    %65 = vector.shape_cast %62 : vector<16x612xf32> to vector<1x1x16x612xf32>
    tpu.vector_store %arg7[%c0_71, %c0_72, %c0_73, %c0_74], %65 {strides = array<i32>} : memref<1x1x16x612xf32, #tpu.memory_space<vmem>>, vector<1x1x16x612xf32>,
    return
  }
  func.func @transform_0(%arg0: i32, %arg1: i32, %arg2: memref<3xi32, #tpu.memory_space<smem>>) -> (i32, i32, i32, i32) {
    %c0_i32 = arith.constant 0 : i32
    %c0_i32_0 = arith.constant 0 : i32
    %c0_i32_1 = arith.constant 0 : i32
    return %arg0, %arg1, %c0_i32, %c0_i32_0 : i32, i32, i32, i32
  }
  func.func @transform_1(%arg0: i32, %arg1: i32, %arg2: memref<3xi32, #tpu.memory_space<smem>>) -> (i32, i32, i32, i32) {
    %0 = arith.index_cast %arg0 : i32 to index
    %1 = memref.load %arg2[%0] : memref<3xi32, #tpu.memory_space<smem>>
    %c0_i32 = arith.constant 0 : i32
    %c0_i32_0 = arith.constant 0 : i32
    %c0_i32_1 = arith.constant 0 : i32
    %c0_i32_2 = arith.constant 0 : i32
    return %1, %c0_i32, %c0_i32_0, %c0_i32_1 : i32, i32, i32, i32
  }
  func.func @transform_2(%arg0: i32, %arg1: i32, %arg2: memref<3xi32, #tpu.memory_space<smem>>) -> (i32, i32, i32) {
    %0 = arith.index_cast %arg0 : i32 to index
    %1 = memref.load %arg2[%0] : memref<3xi32, #tpu.memory_space<smem>>
    %c0_i32 = arith.constant 0 : i32
    %c0_i32_0 = arith.constant 0 : i32
    %c0_i32_1 = arith.constant 0 : i32
    return %1, %c0_i32, %c0_i32_0 : i32, i32, i32
  }
  func.func @transform_3(%arg0: i32, %arg1: i32, %arg2: memref<3xi32, #tpu.memory_space<smem>>) -> (i32, i32) {
    %c0_i32 = arith.constant 0 : i32
    %c0_i32_0 = arith.constant 0 : i32
    %c0_i32_1 = arith.constant 0 : i32
    return %c0_i32, %c0_i32_0 : i32, i32
  }
  func.func @transform_4(%arg0: i32, %arg1: i32, %arg2: memref<3xi32, #tpu.memory_space<smem>>) -> (i32, i32, i32, i32) {
    %c0_i32 = arith.constant 0 : i32
    %c0_i32_0 = arith.constant 0 : i32
    %c0_i32_1 = arith.constant 0 : i32
    return %arg0, %arg1, %c0_i32, %c0_i32_0 : i32, i32, i32, i32
  }
}

</mosaic_0001>

<bundles_post_ra>
// kernel: upsample_block_forward.1
= control target key start
LH: loop header
LB: loop body
LE: loop exit
PB: predicated region body
PF: predicated region fallthrough
CT: control target
= control target key end

     0   :  { %s3860_s0 = inlined_call_operand.vmem [shape: s32[3], index: 0, kind: input, shape index: {}]   ;;  %s3861_s1 = inlined_call_operand.vmem [shape: f32[3,2,4,650], index: 1, kind: input, shape index: {}]   ;;  %s3862_s2 = inlined_call_operand.vmem [shape: f32[2,9,16,4], index: 2, kind: input, shape index: {}]   ;;  %s3863_s3 = inlined_call_operand.vmem [shape: f32[2,16,1], index: 3, kind: input, shape index: {}]   ;;  %s3864_s4 = inlined_call_operand.<no memory space> [shape: f32[1,1], index: 4, kind: input, shape index: {}]   ;;  %s3865_s5 = inlined_call_operand.vmem [shape: f32[3,2,16,612], index: 5, kind: output, shape index: {}]  }
   0x1   :  { %s10_s20 = sshll.u32 %s3860_s0, 4  ;;  %14 = sst [smem:[#allocation4]] %s3864_s4  ;;  %s11_s20 = int_to_ptr.vmem [resolvable:$true] %s10_s20 }
   0x2   :  { %s3240_s23 = scalar_lea.vmem %s11_s20, 16  ;;  %p3245_p1 = scmp.lt.s32.totalorder %s11_s20, %s11_s20 }
   0x3   :  { %p3241_p0 = scmp.ne.s32.totalorder %s11_s20, %s3240_s23  ;;  %p3246_p2 = scmp.lt.s32.totalorder %s3240_s23, %s3240_s23 }
   0x5   :  { %p3247_p3 = por %p3246_p2, %p3245_p1 }
   0x7   :  { %p3248_p4 = pnand %p3247_p3, %p3241_p0 }
   0x9   :  { %3251 = shalt.err (!%p3248_p4)  }
   0xa   :  { %s3294_s24 = smov [#allocation3]  }
   0xb   :  { %13 = dma.vmem_to_smem %s11_s20, 16, %s3294_s24, [#allocation2] }
   0xc   :  { %3272 = dma.done.wait [#allocation2], 16 }
   0xd   :  { %3273 = vsyncadd [#allocation2], 4294967280 }
   0xe   :  { %16 = sfence }
   0xf   :  { %s3341_s25 = smov 0   ;;  %s3343_s0 = smov 0  }
  0x10   :  { %s3345_s26 = smov 0   ;;  %s3347_s4 = smov 0  }
  0x11   :  { %s3349_s27 = smov 0  }
  0x12 LB: > { %s31_s28 = sadd.s32 1, %s3284_s26  ;;  %s34_s29 = sadd.s32 1, %s3288_s4  ;;  %s3292_s27 = sphi %s3349_s27, %s22_s27   ;;  %s3288_s4 = sphi %s3347_s4, %s3898_s4   ;;  %s3284_s26 = sphi %s3345_s26, %s3897_s26   ;;  %s3280_s0 = sphi %s3343_s0, %s3896_s0   ;;  %s3276_s25 = sphi %s3341_s25, %s3895_s25  }
  0x13   : > { %p32_p5 = scmp.ge.s32.totalorder %s31_s28, 2  ;;  %p2983_p6 = scmp.ge.s32.totalorder %s3292_s27, 1 }
  0x14   : > { %p218_p7 = scmp.lt.s32.totalorder %s3292_s27, 7 }
  0x15   : > { %s3900_s28 = smov (%p32_p5, %s31_s28), 0  ;;  %s3902_s29 = smov (!%p32_p5, %s34_s29), %s3288_s4 }
  0x16   : > { %p219_p8 = pnand %p2983_p6, %p218_p7  ;;  %p36_p9 = scmp.ge.s32.totalorder %s3902_s29, 3 }
  0x18   : > { %s3904_s29 = smov (%p36_p9, %s3902_s29), 0  ;;  %222 = sbr.rel (%p219_p8) target bundleno = 457 (0x1c9), region = 36 }
  0x1d   : > { %p264_p10 = scmp.lt.s32.totalorder %s3280_s0, 2  ;;  %p266_p11 = scmp.lt.s32.totalorder %s3276_s25, 1  ;;  %v3295_v0 = vmov 0.0   ;;  %v3304_v12 = vmov 0   ;;  %vm319_vm0 = vcmask 1039360   ;;  %vm331_vm1 = vcmask 1043456  }
  0x1e   : > { %406 = vmatprep.mubr.f32.mxu0 %v3295_v0  ;;  %483 = vmatprep.mubr.f32.mxu1 %v3295_v0  ;;  %s3296_s13 = smov 127   ;;  %s3297_s14 = smov 126   ;;  %vm324_vm2 = vcmask 31744   ;;  %vm837_vm3 = vcmask 1031168   ;;  %vm1118_vm4 = vcmask 900096   ;;  %vm1399_vm5 = vcmask 891904  }
  0x1f   : > { %s3375_s30 = scalar_select %p264_p10, %s3280_s0, 2  ;;  %3235 = vset.pattern.permute.xlu1 %v3304_v12  ;;  %3236 = vset.pattern.permute.xlu0 %v3304_v12  ;;  %vm1680_vm6 = vcmask 883712   ;;  %vm1964_vm7 = vcmask 752640   ;;  %vm2249_vm8 = vcmask 744448   ;;  %vm2534_vm9 = vcmask 736256  }
  0x20   : > { %s3906_s25 = smov (!%p266_p11, %s3276_s25), 1  ;;  %s3298_s15 = smov 110   ;;  %vm2853_vm11 = vcmask 818176  }
  0x21   : > { %s3180_s6 = smul.u32 12, %s3375_s30  ;;  %s3299_s16 = smov 109  }
  0x22   : > { %s3179_s7 = smul.u32 6, %s3906_s25  ;;  %s3300_s17 = smov 108  }
  0x23   : > { %s3301_s18 = smov 92   ;;  %s3302_s19 = smov 91  }
  0x24   : > { %s270_s8 = sadd.s32 %s3180_s6, %s3179_s7  ;;  %s3303_s20 = smov 90  }
  0x25   : > { %s2984_s9 = sshll.u32 %s270_s8, 2  ;;  %s280_s21 = sld [smem:[#allocation3 + %s3280_s0]] }
  0x26   : > { %s3386_s12 = scalar_lea.vmem %s3861_s1, %s2984_s9  ;;  %s273_s7 = sld [smem:[#allocation3 + %s3280_s0]] }
  0x27   : > { %v3389_v1 = vld [vmem:[%s3386_s12 + $0x8] sm:$0xff]  ;;  %v3392_v2 = vld [vmem:[%s3386_s12] sm:$0xff]  ;;  %v3407_v5 = vld [vmem:[%s3386_s12 + $0x10] sm:$0xf]  ;;  %s2817_s0 = sld [smem:[#allocation4]] }
  0x28   : > { %313 = vrot.lane.b32.xlu0 %v3389_v1, %s3296_s13  ;;  %309 = vrot.lane.b32.xlu1 %v3392_v2, %s3296_s13  ;;  %v3398_v3 = vcombine.high %v3389_v1, %v3389_v1  ;;  %v3402_v4 = vcombine.high %v3392_v2, %v3392_v2  ;;  %v821_v6 = vld [vmem:[%s3386_s12 + $0x10] sm:$0xf] }
  0x29   : > { %v1102_v7 = vld [vmem:[%s3386_s12 + $0x10] sm:$0xf] }
  0x2a   : > { %v1383_v8 = vld [vmem:[%s3386_s12 + $0x10] sm:$0xf] }
  0x2b   : > { %v1664_v9 = vld [vmem:[%s3386_s12 + $0x10] sm:$0xf]  ;;  %p281_p12 = scmp.lt.s32.totalorder %s280_s21, 1 }
  0x2c   : > { %315 = vrot.lane.b32.xlu1 %v3398_v3, %s3296_s13  ;;  %311 = vrot.lane.b32.xlu0 %v3402_v4, %s3296_s13  ;;  %v1945_v10 = vld [vmem:[%s3386_s12 + $0x10] sm:$0xff]  ;;  %p274_p13 = scmp.lt.s32.totalorder %s273_s7, 1  ;;  %s3182_s12 = smul.u32 10, %s3906_s25 }
  0x2d   : > { %v1951_v11 = vcombine.high %v1945_v10, %v1945_v10  ;;  %s3908_s21 = smov (!%p281_p12, %s280_s21), 1 }
  0x2e   : > { %s3106_s22 = sshll.u32 %s3908_s21, 4  ;;  %s3910_s7 = smov (!%p274_p13, %s273_s7), 1 }
  0x2f   : > { %s285_s6 = scalar_lea.vmem %s3863_s3, %s3106_s22  ;;  %s3181_s8 = smul.u32 144, %s3910_s7 }
  0x30   : > { %827 = vrot.lane.b32.xlu1 %v3392_v2, %s3297_s14  ;;  %317 = vrot.lane.b32.xlu0 %v3407_v5, %s3296_s13  ;;  %v2795_v13 = vld [vmem:[%s285_s6] sm:$0xff]  ;;  %v2796_v14 = vld [vmem:[%s285_s6 + $0x8] sm:$0xff]  ;;  %s3183_s13 = smul.u32 20, %s3375_s30 }
  0x31   : > { %s3451_s11 = scalar_lea.vmem %s3862_s2, %s3181_s8 }
  0x32   : > { %v2989_v21 = vld [vmem:[%s3451_s11 + $0x10] sm:$0xff]  ;;  %v2990_v25 = vld [vmem:[%s3451_s11 + $0x18] sm:$0xff]  ;;  %v296_v32 = vld [vmem:[%s3451_s11] sm:$0xff]  ;;  %s3796_s25 = sadd.s32 %s3183_s13, %s3182_s12 }
  0x33   : > { %v297_v37 = vld [vmem:[%s3451_s11 + $0x8] sm:$0xff]  ;;  %v3013_v40 = vld [vmem:[%s3451_s11 + $0x20] sm:$0xff]  ;;  %v3026_v54 = vld [vmem:[%s3451_s11 + $0x30] sm:$0xff]  ;;  %s2988_s30 = sshll.u32 %s3796_s25, 3 }
  0x34   : > { %829 = vrot.lane.b32.xlu1 %v3402_v4, %s3297_s14  ;;  %831 = vrot.lane.b32.xlu0 %v3389_v1, %s3297_s14  ;;  %v3014_v46 = vld [vmem:[%s3451_s11 + $0x28] sm:$0xff]  ;;  %v3027_v59 = vld [vmem:[%s3451_s11 + $0x38] sm:$0xff] }
  0x35   : > { %v3039_v62 = vld [vmem:[%s3451_s11 + $0x40] sm:$0xff] }
  0x38   : > { %835 = vrot.lane.b32.xlu1 %v821_v6, %s3297_s14  ;;  %833 = vrot.lane.b32.xlu0 %v3398_v3, %s3297_s14 }
  0x3c   : > { %1112 = vrot.lane.b32.xlu1 %v3389_v1, %s3298_s15  ;;  %1110 = vrot.lane.b32.xlu0 %v3402_v4, %s3298_s15 }
  0x40   : > { %1116 = vrot.lane.b32.xlu1 %v1102_v7, %s3298_s15  ;;  %1114 = vrot.lane.b32.xlu0 %v3398_v3, %s3298_s15 }
  0x44   : > { %1391 = vrot.lane.b32.xlu1 %v3402_v4, %s3299_s16  ;;  %1108 = vrot.lane.b32.xlu0 %v3392_v2, %s3298_s15 }
  0x48   : > { %1389 = vrot.lane.b32.xlu1 %v3392_v2, %s3299_s16  ;;  %1393 = vrot.lane.b32.xlu0 %v3389_v1, %s3299_s16 }
  0x4c   : > { %1397 = vrot.lane.b32.xlu1 %v1383_v8, %s3299_s16  ;;  %1395 = vrot.lane.b32.xlu0 %v3398_v3, %s3299_s16  ;;  %s3817_s16 = scalar_lea.vmem %s3865_s5, %s2988_s30 }
  0x50   : > { %1674 = vrot.lane.b32.xlu1 %v3389_v1, %s3300_s17  ;;  %1672 = vrot.lane.b32.xlu0 %v3402_v4, %s3300_s17 }
  0x54   : > { %1678 = vrot.lane.b32.xlu1 %v1664_v9, %s3300_s17  ;;  %1676 = vrot.lane.b32.xlu0 %v3398_v3, %s3300_s17 }
  0x58   : > { %1954 = vrot.lane.b32.xlu1 %v3402_v4, %s3301_s18  ;;  %1670 = vrot.lane.b32.xlu0 %v3392_v2, %s3300_s17 }
  0x5c   : > { %1952 = vrot.lane.b32.xlu1 %v3392_v2, %s3301_s18  ;;  %1956 = vrot.lane.b32.xlu0 %v3389_v1, %s3301_s18 }
  0x60   : > { %1960 = vrot.lane.b32.xlu1 %v1945_v10, %s3301_s18  ;;  %1958 = vrot.lane.b32.xlu0 %v3398_v3, %s3301_s18 }
  0x64   : > { %2239 = vrot.lane.b32.xlu1 %v3402_v4, %s3302_s19  ;;  %1962 = vrot.lane.b32.xlu0 %v1951_v11, %s3301_s18 }
  0x68   : > { %2243 = vrot.lane.b32.xlu1 %v3398_v3, %s3302_s19  ;;  %2241 = vrot.lane.b32.xlu0 %v3389_v1, %s3302_s19 }
  0x6c   : > { %2237 = vrot.lane.b32.xlu1 %v3392_v2, %s3302_s19  ;;  %2245 = vrot.lane.b32.xlu0 %v1945_v10, %s3302_s19 }
  0x70   : > { %2524 = vrot.lane.b32.xlu1 %v3402_v4, %s3303_s20  ;;  %2247 = vrot.lane.b32.xlu0 %v1951_v11, %s3302_s19 }
  0x74   : > { %2522 = vrot.lane.b32.xlu1 %v3392_v2, %s3303_s20  ;;  %2526 = vrot.lane.b32.xlu0 %v3389_v1, %s3303_s20 }
  0x78   : > { %2528 = vrot.lane.b32.xlu0 %v3398_v3, %s3303_s20  ;;  %2530 = vrot.lane.b32.xlu1 %v1945_v10, %s3303_s20 }
  0x7c   : > { %2532 = vrot.lane.b32.xlu0 %v1951_v11, %s3303_s20  ;;  %2799 = vperm.xlu1 %3235, %v2795_v13   ;;  %v3052_v13 = vld [vmem:[%s3451_s11 + $0x50] sm:$0xff] }
  0x80   : > { %2804 = vperm.xlu0 %3236, %v2796_v14  }
  0x9a   : > { %v314_v15 = vpop.permute.xlu0 %313  ;;  %v310_v16 = vpop.permute.xlu1 %309 }
  0x9e   : > { %v316_v17 = vpop.permute.xlu1 %315  ;;  %v312_v18 = vpop.permute.xlu0 %311 }
  0x9f   : > { %v321_v19 = vsel %vm319_vm0, %v312_v18, %v314_v15  ;;  %v320_v20 = vsel %vm319_vm0, %v310_v16, %v312_v18  ;;  %v322_v26 = vsel %vm319_vm0, %v314_v15, %v316_v17 }
  0xa0   : > { %2991 = vmatprep.subr.msk.mxu0 %vm331_vm1, %v321_v19  ;;  %v3053_v19 = vld [vmem:[%s3451_s11 + $0x58] sm:$0xff] }
  0xa1   : > { %2992 = vmatpush1.msk.msra.mxu0 %vm331_vm1, %v320_v20 }
  0xa2   : > { %v828_v22 = vpop.permute.xlu1 %827  ;;  %2993 = vmatmul.mubr.msk.f32.vlgmr.msra.gmra.mxu0 %vm324_vm2, %v2989_v21  ;;  %v318_v23 = vpop.permute.xlu0 %317 }
  0xa3   : > { %3134 = vmatprep.subr.msk.mxu0 %vm331_vm1, %v318_v23  ;;  %v323_v24 = vsel %vm319_vm0, %v316_v17, %v318_v23  ;;  %412 = vmatprep.mubr.f32.mxu0 %v3295_v0 }
  0xa4   : > { %2995 = vmatprep.subr.msk.mxu1 %vm331_vm1, %v323_v24  ;;  %3135 = vmatpush3.msk.msra.mxu0 %vm331_vm1, %v318_v23 }
  0xa5   : > { %2996 = vmatpush1.msk.msra.mxu1 %vm331_vm1, %v322_v26  ;;  %3006 = vmatprep.subr.msk.mxu0 %vm331_vm1, %v3398_v3 }
  0xa6   : > { %v830_v27 = vpop.permute.xlu1 %829  ;;  %2994 = vmatmul.mubr.msk.f32.gmra.mxu0 %vm324_vm2, %v2990_v25  ;;  %2997 = vmatmul.mubr.msk.f32.vlgmr.msra.gmra.mxu1 %vm324_vm2, %v2989_v21  ;;  %v832_v28 = vpop.permute.xlu0 %831 }
  0xa7   : > { %3002 = vmatprep.subr.msk.mxu1 %vm331_vm1, %v3402_v4  ;;  %489 = vmatprep.mubr.f32.mxu1 %v3295_v0  ;;  %v839_v29 = vsel %vm837_vm3, %v830_v27, %v832_v28  ;;  %v838_v34 = vsel %vm837_vm3, %v828_v22, %v830_v27  ;;  %v3065_v22 = vld [vmem:[%s3451_s11 + $0x60] sm:$0xff] }
  0xa8   : > { %3003 = vmatpush1.msk.msra.mxu1 %vm331_vm1, %v3392_v2  ;;  %3136 = vmatprep.mubr.msk.f32.mxu0 %vm324_vm2, %v2989_v21 }
  0xa9   : > { %3139 = vmatprep.subr.msk.mxu1 %vm331_vm1, %v3407_v5 }
  0xaa   : > { %v836_v30 = vpop.permute.xlu1 %835  ;;  %2998 = vmatmul.mubr.msk.f32.gmra.mxu1 %vm324_vm2, %v2990_v25  ;;  %3137 = vmatmul.mubr.msk.f32.vlgmr.msra.gmra.mxu0 %vm324_vm2, %v2990_v25  ;;  %v834_v31 = vpop.permute.xlu0 %833 }
  0xab   : > { %3007 = vmatpush1.msk.msra.mxu0 %vm331_vm1, %v3389_v1  ;;  %651 = vmatprep.mubr.f32.mxu1 %v3295_v0  ;;  %v841_v33 = vsel %vm837_vm3, %v834_v31, %v836_v30  ;;  %v840_v43 = vsel %vm837_vm3, %v832_v28, %v834_v31  ;;  %v3066_v28 = vld [vmem:[%s3451_s11 + $0x68] sm:$0xff] }
  0xac   : > { %3015 = vmatprep.subr.msk.mxu0 %vm331_vm1, %v839_v29  ;;  %728 = vmatprep.mubr.f32.mxu0 %v3295_v0 }
  0xae   : > { %v1113_v35 = vpop.permute.xlu1 %1112  ;;  %3004 = vmatmul.mubr.msk.f32.vlgmr.msra.gmra.mxu1 %vm324_vm2, %v296_v32  ;;  %3008 = vmatmul.mubr.msk.f32.vlgmr.msra.gmra.mxu0 %vm324_vm2, %v296_v32  ;;  %v1111_v36 = vpop.permute.xlu0 %1110 }
  0xaf   : > { %3140 = vmatpush3.msk.msra.mxu1 %vm331_vm1, %v3407_v5  ;;  %3016 = vmatpush1.msk.msra.mxu0 %vm331_vm1, %v838_v34  ;;  %v1120_v41 = vsel %vm1118_vm4, %v1111_v36, %v1113_v35  ;;  %v3040_v5 = vld [vmem:[%s3451_s11 + $0x48] sm:$0xff] }
  0xb0   : > { %3019 = vmatprep.subr.msk.mxu1 %vm331_vm1, %v841_v33  ;;  %3144 = vmatprep.subr.msk.mxu0 %vm331_vm1, %v836_v30 }
  0xb1   : > { %657 = vmatprep.mubr.f32.mxu1 %v3295_v0  ;;  %734 = vmatprep.mubr.f32.mxu0 %v3295_v0 }
  0xb2   : > { %v1117_v38 = vpop.permute.xlu1 %1116  ;;  %3005 = vmatmul.mubr.msk.f32.gmra.mxu1 %vm324_vm2, %v297_v37  ;;  %3009 = vmatmul.mubr.msk.f32.gmra.mxu0 %vm324_vm2, %v297_v37  ;;  %v1115_v39 = vpop.permute.xlu0 %1114 }
  0xb3   : > { %3141 = vmatprep.mubr.msk.f32.mxu1 %vm324_vm2, %v296_v32  ;;  %922 = vmatprep.mubr.f32.mxu0 %v3295_v0  ;;  %v1122_v42 = vsel %vm1118_vm4, %v1115_v39, %v1117_v38  ;;  %v1121_v51 = vsel %vm1118_vm4, %v1113_v35, %v1115_v39 }
  0xb6   : > { %v1392_v44 = vpop.permute.xlu1 %1391  ;;  %3142 = vmatmul.mubr.msk.f32.vlgmr.msra.gmra.mxu1 %vm324_vm2, %v297_v37  ;;  %3017 = vmatmul.mubr.msk.f32.vlgmr.msra.gmra.mxu0 %vm324_vm2, %v3013_v40  ;;  %v1109_v45 = vpop.permute.xlu0 %1108  ;;  %v3078_v37 = vld [vmem:[%s3451_s11 + $0x70] sm:$0xff] }
  0xb7   : > { %3020 = vmatpush1.msk.msra.mxu1 %vm331_vm1, %v840_v43  ;;  %3145 = vmatpush3.msk.msra.mxu0 %vm331_vm1, %v836_v30  ;;  %v1119_v47 = vsel %vm1118_vm4, %v1109_v45, %v1111_v36  ;;  %v3091_v45 = vld [vmem:[%s3451_s11 + $0x80] sm:$0xff] }
  0xb8   : > { %3028 = vmatprep.subr.msk.mxu1 %vm331_vm1, %v1120_v41  ;;  %3032 = vmatprep.subr.msk.mxu0 %vm331_vm1, %v1122_v42  ;;  %v3079_v42 = vld [vmem:[%s3451_s11 + $0x78] sm:$0xff] }
  0xb9   : > { %928 = vmatprep.mubr.f32.mxu0 %v3295_v0  ;;  %999 = vmatprep.mubr.f32.mxu1 %v3295_v0 }
  0xba   : > { %v1390_v48 = vpop.permute.xlu1 %1389  ;;  %3018 = vmatmul.mubr.msk.f32.gmra.mxu0 %vm324_vm2, %v3014_v46  ;;  %3021 = vmatmul.mubr.msk.f32.vlgmr.msra.gmra.mxu1 %vm324_vm2, %v3013_v40  ;;  %v1394_v49 = vpop.permute.xlu0 %1393 }
  0xbb   : > { %3029 = vmatpush1.msk.msra.mxu1 %vm331_vm1, %v1119_v47  ;;  %1005 = vmatprep.mubr.f32.mxu1 %v3295_v0  ;;  %v1401_v50 = vsel %vm1399_vm5, %v1392_v44, %v1394_v49  ;;  %v1400_v56 = vsel %vm1399_vm5, %v1390_v48, %v1392_v44  ;;  %v3092_v47 = vld [vmem:[%s3451_s11 + $0x88] sm:$0xff] }
  0xbc   : > { %3149 = vmatprep.subr.msk.mxu1 %vm331_vm1, %v1117_v38  ;;  %3146 = vmatprep.mubr.msk.f32.mxu0 %vm324_vm2, %v3013_v40 }
  0xbe   : > { %v1398_v52 = vpop.permute.xlu1 %1397  ;;  %3022 = vmatmul.mubr.msk.f32.gmra.mxu1 %vm324_vm2, %v3014_v46  ;;  %3147 = vmatmul.mubr.msk.f32.vlgmr.msra.gmra.mxu0 %vm324_vm2, %v3014_v46  ;;  %v1396_v53 = vpop.permute.xlu0 %1395 }
  0xbf   : > { %3033 = vmatpush1.msk.msra.mxu0 %vm331_vm1, %v1121_v51  ;;  %1203 = vmatprep.mubr.f32.mxu1 %v3295_v0  ;;  %v1403_v55 = vsel %vm1399_vm5, %v1396_v53, %v1398_v52  ;;  %v1402_v2 = vsel %vm1399_vm5, %v1394_v49, %v1396_v53 }
  0xc0   : > { %3041 = vmatprep.subr.msk.mxu0 %vm331_vm1, %v1401_v50  ;;  %1280 = vmatprep.mubr.f32.mxu0 %v3295_v0 }
  0xc2   : > { %v1675_v57 = vpop.permute.xlu1 %1674  ;;  %3030 = vmatmul.mubr.msk.f32.vlgmr.msra.gmra.mxu1 %vm324_vm2, %v3026_v54  ;;  %3034 = vmatmul.mubr.msk.f32.vlgmr.msra.gmra.mxu0 %vm324_vm2, %v3026_v54  ;;  %v1673_v58 = vpop.permute.xlu0 %1672 }
  0xc3   : > { %3150 = vmatpush3.msk.msra.mxu1 %vm331_vm1, %v1117_v38  ;;  %3042 = vmatpush1.msk.msra.mxu0 %vm331_vm1, %v1400_v56  ;;  %v1682_v63 = vsel %vm1680_vm6, %v1673_v58, %v1675_v57 }
  0xc4   : > { %3045 = vmatprep.subr.msk.mxu1 %vm331_vm1, %v1403_v55  ;;  %3154 = vmatprep.subr.msk.mxu0 %vm331_vm1, %v1398_v52 }
  0xc5   : > { %1209 = vmatprep.mubr.f32.mxu1 %v3295_v0  ;;  %1286 = vmatprep.mubr.f32.mxu0 %v3295_v0 }
  0xc6   : > { %v1679_v60 = vpop.permute.xlu1 %1678  ;;  %3031 = vmatmul.mubr.msk.f32.gmra.mxu1 %vm324_vm2, %v3027_v59  ;;  %3035 = vmatmul.mubr.msk.f32.gmra.mxu0 %vm324_vm2, %v3027_v59  ;;  %v1677_v61 = vpop.permute.xlu0 %1676 }
  0xc7   : > { %3151 = vmatprep.mubr.msk.f32.mxu1 %vm324_vm2, %v3026_v54  ;;  %1484 = vmatprep.mubr.f32.mxu0 %v3295_v0  ;;  %v1684_v1 = vsel %vm1680_vm6, %v1677_v61, %v1679_v60  ;;  %v1683_v10 = vsel %vm1680_vm6, %v1675_v57, %v1677_v61 }
  0xca   : > { %v1955_v3 = vpop.permute.xlu1 %1954  ;;  %3152 = vmatmul.mubr.msk.f32.vlgmr.msra.gmra.mxu1 %vm324_vm2, %v3027_v59  ;;  %3043 = vmatmul.mubr.msk.f32.vlgmr.msra.gmra.mxu0 %vm324_vm2, %v3039_v62  ;;  %v1671_v4 = vpop.permute.xlu0 %1670 }
  0xcb   : > { %3046 = vmatpush1.msk.msra.mxu1 %vm331_vm1, %v1402_v2  ;;  %3155 = vmatpush3.msk.msra.mxu0 %vm331_vm1, %v1398_v52  ;;  %v1681_v6 = vsel %vm1680_vm6, %v1671_v4, %v1673_v58 }
  0xcc   : > { %3054 = vmatprep.subr.msk.mxu1 %vm331_vm1, %v1682_v63  ;;  %3058 = vmatprep.subr.msk.mxu0 %vm331_vm1, %v1684_v1 }
  0xcd   : > { %1490 = vmatprep.mubr.f32.mxu0 %v3295_v0  ;;  %1561 = vmatprep.mubr.f32.mxu1 %v3295_v0 }
  0xce   : > { %v1953_v7 = vpop.permute.xlu1 %1952  ;;  %3044 = vmatmul.mubr.msk.f32.gmra.mxu0 %vm324_vm2, %v3040_v5  ;;  %3047 = vmatmul.mubr.msk.f32.vlgmr.msra.gmra.mxu1 %vm324_vm2, %v3039_v62  ;;  %v1957_v8 = vpop.permute.xlu0 %1956 }
  0xcf   : > { %3055 = vmatpush1.msk.msra.mxu1 %vm331_vm1, %v1681_v6  ;;  %1567 = vmatprep.mubr.f32.mxu1 %v3295_v0  ;;  %v1966_v9 = vsel %vm1964_vm7, %v1955_v3, %v1957_v8  ;;  %v1965_v15 = vsel %vm1964_vm7, %v1953_v7, %v1955_v3 }
  0xd0   : > { %3159 = vmatprep.subr.msk.mxu1 %vm331_vm1, %v1679_v60  ;;  %3156 = vmatprep.mubr.msk.f32.mxu0 %vm324_vm2, %v3039_v62 }
  0xd2   : > { %v1961_v11 = vpop.permute.xlu1 %1960  ;;  %3048 = vmatmul.mubr.msk.f32.gmra.mxu1 %vm324_vm2, %v3040_v5  ;;  %3157 = vmatmul.mubr.msk.f32.vlgmr.msra.gmra.mxu0 %vm324_vm2, %v3040_v5  ;;  %v1959_v12 = vpop.permute.xlu0 %1958 }
  0xd3   : > { %3059 = vmatpush1.msk.msra.mxu0 %vm331_vm1, %v1683_v10  ;;  %1765 = vmatprep.mubr.f32.mxu1 %v3295_v0  ;;  %v1968_v14 = vsel %vm1964_vm7, %v1959_v12, %v1961_v11  ;;  %v1967_v24 = vsel %vm1964_vm7, %v1957_v8, %v1959_v12 }
  0xd4   : > { %3067 = vmatprep.subr.msk.mxu0 %vm331_vm1, %v1966_v9  ;;  %1842 = vmatprep.mubr.f32.mxu0 %v3295_v0 }
  0xd6   : > { %v2240_v16 = vpop.permute.xlu1 %2239  ;;  %3056 = vmatmul.mubr.msk.f32.vlgmr.msra.gmra.mxu1 %vm324_vm2, %v3052_v13  ;;  %3060 = vmatmul.mubr.msk.f32.vlgmr.msra.gmra.mxu0 %vm324_vm2, %v3052_v13  ;;  %v1963_v17 = vpop.permute.xlu0 %1962 }
  0xd7   : > { %3160 = vmatpush3.msk.msra.mxu1 %vm331_vm1, %v1679_v60  ;;  %3068 = vmatpush1.msk.msra.mxu0 %vm331_vm1, %v1965_v15  ;;  %v1969_v18 = vsel %vm1964_vm7, %v1961_v11, %v1963_v17 }
  0xd8   : > { %3071 = vmatprep.subr.msk.mxu1 %vm331_vm1, %v1968_v14  ;;  %3164 = vmatprep.subr.msk.mxu0 %vm331_vm1, %v1969_v18 }
  0xd9   : > { %1771 = vmatprep.mubr.f32.mxu1 %v3295_v0  ;;  %1848 = vmatprep.mubr.f32.mxu0 %v3295_v0 }
  0xda   : > { %v2244_v20 = vpop.permute.xlu1 %2243  ;;  %3057 = vmatmul.mubr.msk.f32.gmra.mxu1 %vm324_vm2, %v3053_v19  ;;  %3061 = vmatmul.mubr.msk.f32.gmra.mxu0 %vm324_vm2, %v3053_v19  ;;  %v2242_v21 = vpop.permute.xlu0 %2241 }
  0xdb   : > { %3161 = vmatprep.mubr.msk.f32.mxu1 %vm324_vm2, %v3052_v13  ;;  %2050 = vmatprep.mubr.f32.mxu0 %v3295_v0  ;;  %v2251_v23 = vsel %vm2249_vm8, %v2240_v16, %v2242_v21  ;;  %v2252_v33 = vsel %vm2249_vm8, %v2242_v21, %v2244_v20 }
  0xde   : > { %v2238_v25 = vpop.permute.xlu1 %2237  ;;  %3162 = vmatmul.mubr.msk.f32.vlgmr.msra.gmra.mxu1 %vm324_vm2, %v3053_v19  ;;  %3069 = vmatmul.mubr.msk.f32.vlgmr.msra.gmra.mxu0 %vm324_vm2, %v3065_v22  ;;  %v2246_v26 = vpop.permute.xlu0 %2245 }
  0xdf   : > { %3072 = vmatpush1.msk.msra.mxu1 %vm331_vm1, %v1967_v24  ;;  %3165 = vmatpush3.msk.msra.mxu0 %vm331_vm1, %v1969_v18  ;;  %v2253_v27 = vsel %vm2249_vm8, %v2244_v20, %v2246_v26  ;;  %v2250_v29 = vsel %vm2249_vm8, %v2238_v25, %v2240_v16 }
  0xe0   : > { %3080 = vmatprep.subr.msk.mxu1 %vm331_vm1, %v2251_v23  ;;  %3084 = vmatprep.subr.msk.mxu0 %vm331_vm1, %v2253_v27 }
  0xe1   : > { %2056 = vmatprep.mubr.f32.mxu0 %v3295_v0  ;;  %2127 = vmatprep.mubr.f32.mxu1 %v3295_v0 }
  0xe2   : > { %v2525_v30 = vpop.permute.xlu1 %2524  ;;  %3070 = vmatmul.mubr.msk.f32.gmra.mxu0 %vm324_vm2, %v3066_v28  ;;  %3073 = vmatmul.mubr.msk.f32.vlgmr.msra.gmra.mxu1 %vm324_vm2, %v3065_v22  ;;  %v2248_v31 = vpop.permute.xlu0 %2247 }
  0xe3   : > { %3081 = vmatpush1.msk.msra.mxu1 %vm331_vm1, %v2250_v29  ;;  %v2254_v32 = vsel %vm2249_vm8, %v2246_v26, %v2248_v31  ;;  %2133 = vmatprep.mubr.f32.mxu1 %v3295_v0 }
  0xe4   : > { %3169 = vmatprep.subr.msk.mxu1 %vm331_vm1, %v2254_v32  ;;  %3166 = vmatprep.mubr.msk.f32.mxu0 %vm324_vm2, %v3065_v22 }
  0xe6   : > { %v2523_v34 = vpop.permute.xlu1 %2522  ;;  %3074 = vmatmul.mubr.msk.f32.gmra.mxu1 %vm324_vm2, %v3066_v28  ;;  %3167 = vmatmul.mubr.msk.f32.vlgmr.msra.gmra.mxu0 %vm324_vm2, %v3066_v28  ;;  %v2527_v35 = vpop.permute.xlu0 %2526 }
  0xe7   : > { %3085 = vmatpush1.msk.msra.mxu0 %vm331_vm1, %v2252_v33  ;;  %v2536_v36 = vsel %vm2534_vm9, %v2525_v30, %v2527_v35  ;;  %2335 = vmatprep.mubr.f32.mxu1 %v3295_v0  ;;  %v2535_v38 = vsel %vm2534_vm9, %v2523_v34, %v2525_v30 }
  0xe8   : > { %3093 = vmatprep.subr.msk.mxu0 %vm331_vm1, %v2536_v36  ;;  %2412 = vmatprep.mubr.f32.mxu0 %v3295_v0 }
  0xea   : > { %3082 = vmatmul.mubr.msk.f32.vlgmr.msra.gmra.mxu1 %vm324_vm2, %v3078_v37  ;;  %3086 = vmatmul.mubr.msk.f32.vlgmr.msra.gmra.mxu0 %vm324_vm2, %v3078_v37  ;;  %v2529_v39 = vpop.permute.xlu0 %2528  ;;  %v2531_v40 = vpop.permute.xlu1 %2530 }
  0xeb   : > { %3170 = vmatpush3.msk.msra.mxu1 %vm331_vm1, %v2254_v32  ;;  %3094 = vmatpush1.msk.msra.mxu0 %vm331_vm1, %v2535_v38  ;;  %v2538_v41 = vsel %vm2534_vm9, %v2529_v39, %v2531_v40  ;;  %v2537_v46 = vsel %vm2534_vm9, %v2527_v35, %v2529_v39 }
  0xec   : > { %2341 = vmatprep.mubr.f32.mxu1 %v3295_v0  ;;  %2418 = vmatprep.mubr.f32.mxu0 %v3295_v0 }
  0xed   : > { %3097 = vmatprep.subr.msk.mxu1 %vm331_vm1, %v2538_v41 }
  0xee   : > { %3083 = vmatmul.mubr.msk.f32.gmra.mxu1 %vm324_vm2, %v3079_v42  ;;  %3087 = vmatmul.mubr.msk.f32.gmra.mxu0 %vm324_vm2, %v3079_v42  ;;  %v2533_v43 = vpop.permute.xlu0 %2532 }
  0xef   : > { %v2539_v44 = vsel %vm2534_vm9, %v2531_v40, %v2533_v43  ;;  %3171 = vmatprep.mubr.msk.f32.mxu1 %vm324_vm2, %v3078_v37  ;;  %2620 = vmatprep.mubr.f32.mxu0 %v3295_v0 }
  0xf0   : > { %3174 = vmatprep.subr.msk.mxu0 %vm331_vm1, %v2539_v44 }
  0xf2   : > { %3172 = vmatmul.mubr.msk.f32.vlgmr.msra.gmra.mxu1 %vm324_vm2, %v3079_v42  ;;  %3095 = vmatmul.mubr.msk.f32.vlgmr.msra.gmra.mxu0 %vm324_vm2, %v3091_v45 }
  0xf3   : > { %3098 = vmatpush1.msk.msra.mxu1 %vm331_vm1, %v2537_v46  ;;  %3175 = vmatpush3.msk.msra.mxu0 %vm331_vm1, %v2539_v44 }
  0xf4   : > { %2626 = vmatprep.mubr.f32.mxu0 %v3295_v0  ;;  %2697 = vmatprep.mubr.f32.mxu1 %v3295_v0 }
  0xf6   : > { %3096 = vmatmul.mubr.msk.f32.gmra.mxu0 %vm324_vm2, %v3092_v47  ;;  %3099 = vmatmul.mubr.msk.f32.vlgmr.msra.gmra.mxu1 %vm324_vm2, %v3091_v45 }
  0xf7   : > { %2703 = vmatprep.mubr.f32.mxu1 %v3295_v0  ;;  %3176 = vmatprep.mubr.msk.f32.mxu0 %vm324_vm2, %v3091_v45 }
  0xfa   : > { %3100 = vmatmul.mubr.msk.f32.gmra.mxu1 %vm324_vm2, %v3092_v47  ;;  %3177 = vmatmul.mubr.msk.f32.vlgmr.msra.gmra.mxu0 %vm324_vm2, %v3092_v47 }
 0x162   : > { %v3654_v48 = vpop.f32.mrf.mxu0 }
 0x164   : > { %v3656_v49 = vpop.f32.mrf.mxu0 }
 0x166   : > { %v3658_v50 = vpop.f32.mrf.mxu0  ;;  %v3660_v51 = vpop.f32.mrf.mxu1 }
 0x168   : > { %v3662_v52 = vpop.f32.mrf.mxu0  ;;  %v3664_v53 = vpop.f32.mrf.mxu1 }
 0x16a   : > { %v3666_v54 = vpop.f32.mrf.mxu1  ;;  %v3668_v0 = vpop.f32.mrf.mxu0 }
 0x16c   : > { %v3670_v55 = vpop.f32.mrf.mxu1  ;;  %v3672_v56 = vpop.f32.mrf.mxu0 }
 0x16e   : > { %v653_v57 = vpop.f32.mrf.mxu1  ;;  %v730_v58 = vpop.f32.mrf.mxu0 }
 0x170   : > { %v655_v59 = vpop.f32.mrf.mxu1  ;;  %v732_v60 = vpop.f32.mrf.mxu0 }
 0x172   : > { %v659_v61 = vpop.f32.mrf.mxu1  ;;  %v736_v62 = vpop.f32.mrf.mxu0 }
 0x174   : > { %v661_v63 = vpop.f32.mrf.mxu1  ;;  %v738_v1 = vpop.f32.mrf.mxu0 }
 0x176   : > { %v3143_v2 = vpop.f32.mrf.mxu1  ;;  %v924_v3 = vpop.f32.mrf.mxu0 }
 0x178   : > { %v807_v4 = vpop.f32.mrf.mxu1  ;;  %v926_v5 = vpop.f32.mrf.mxu0 }
 0x17a   : > { %v930_v6 = vpop.f32.mrf.mxu0  ;;  %v1001_v7 = vpop.f32.mrf.mxu1 }
 0x17c   : > { %v932_v8 = vpop.f32.mrf.mxu0  ;;  %v1003_v9 = vpop.f32.mrf.mxu1 }
 0x17e   : > { %v3674_v10 = vpop.f32.mrf.mxu1  ;;  %v3676_v11 = vpop.f32.mrf.mxu0 }
 0x180   : > { %v3678_v12 = vpop.f32.mrf.mxu1  ;;  %v3680_v13 = vpop.f32.mrf.mxu0 }
 0x182   : > { %v1205_v14 = vpop.f32.mrf.mxu1  ;;  %v3682_v15 = vpop.f32.mrf.mxu0 }
 0x184   : > { %v3684_v16 = vpop.f32.mrf.mxu1  ;;  %v3686_v17 = vpop.f32.mrf.mxu0 }
 0x186   : > { %v3688_v18 = vpop.f32.mrf.mxu1  ;;  %v3690_v19 = vpop.f32.mrf.mxu0 }
 0x188   : > { %v3692_v20 = vpop.f32.mrf.mxu1  ;;  %v3694_v21 = vpop.f32.mrf.mxu0 }
 0x18a   : > { %v3696_v22 = vpop.f32.mrf.mxu1  ;;  %v1486_v23 = vpop.f32.mrf.mxu0 }
 0x18c   : > { %v3698_v24 = vpop.f32.mrf.mxu1  ;;  %v3700_v25 = vpop.f32.mrf.mxu0 }
 0x18e   : > { %v3702_v26 = vpop.f32.mrf.mxu0  ;;  %v3704_v27 = vpop.f32.mrf.mxu1 }
 0x190   : > { %v3706_v28 = vpop.f32.mrf.mxu0  ;;  %v3708_v29 = vpop.f32.mrf.mxu1 }
 0x192   : > { %v3710_v30 = vpop.f32.mrf.mxu1  ;;  %v3712_v31 = vpop.f32.mrf.mxu0 }
 0x194   : > { %v3714_v32 = vpop.f32.mrf.mxu1  ;;  %v3716_v33 = vpop.f32.mrf.mxu0 }
 0x196   : > { %v1767_v34 = vpop.f32.mrf.mxu1  ;;  %v3718_v35 = vpop.f32.mrf.mxu0 }
 0x197   : > { %3867 = vst [vmem:[#allocation6_spill] sm:$0xff] %v3718_v35 }
 0x198   : > { %v3720_v36 = vpop.f32.mrf.mxu1  ;;  %v3722_v37 = vpop.f32.mrf.mxu0 }
 0x199   : > { %3868 = vst [vmem:[#allocation7_spill] sm:$0xff] %v3722_v37 }
 0x19a   : > { %v3724_v38 = vpop.f32.mrf.mxu1  ;;  %v3726_v39 = vpop.f32.mrf.mxu0 }
 0x19b   : > { %3869 = vst [vmem:[#allocation8_spill] sm:$0xff] %v3724_v38  ;;  %3870 = vst [vmem:[#allocation9_spill] sm:$0xff] %v3726_v39  ;;  %v3747_v39 = vstv %s2817_s0 }
 0x19c   : > { %v3728_v40 = vpop.f32.mrf.mxu1  ;;  %v3730_v41 = vpop.f32.mrf.mxu0  ;;  %3879 = vst [vmem:[#allocation18_spill] sm:$0xff] %v3747_v39  ;;  %v813_v39 = vadd.f32 %v3143_v2, %v3668_v0 }
 0x19d   : > { %3871 = vst [vmem:[#allocation10_spill] sm:$0xff] %v3728_v40  ;;  %3872 = vst [vmem:[#allocation11_spill] sm:$0xff] %v3730_v41  ;;  %v654_v40 = vadd.f32 %v653_v57, %v3654_v48  ;;  %v731_v41 = vadd.f32 %v730_v58, %v3660_v51  ;;  %v739_v48 = vadd.f32 %v738_v1, %v3670_v55 }
 0x19e   : > { %v3732_v42 = vpop.f32.mrf.mxu1  ;;  %v2052_v43 = vpop.f32.mrf.mxu0  ;;  %v808_v51 = vadd.f32 %v807_v4, %v3672_v56 }
 0x19f   : > { %3873 = vst [vmem:[#allocation12_spill] sm:$0xff] %v3732_v42  ;;  %v656_v42 = vadd.f32 %v655_v59, %v3656_v49  ;;  %v1087_v57 = vadd.f32 %v924_v3, %v654_v40  ;;  %v1089_v59 = vadd.f32 %v1001_v7, %v731_v41  ;;  %v1095_v55 = vadd.f32 %v3678_v12, %v739_v48 }
 0x1a0   : > { %v3734_v44 = vpop.f32.mrf.mxu1  ;;  %v3736_v45 = vpop.f32.mrf.mxu0  ;;  %v1091_v0 = vadd.f32 %v3680_v13, %v808_v51 }
 0x1a1   : > { %3874 = vst [vmem:[#allocation13_spill] sm:$0xff] %v3734_v44  ;;  %3875 = vst [vmem:[#allocation14_spill] sm:$0xff] %v3736_v45  ;;  %v733_v44 = vadd.f32 %v732_v60, %v3664_v53  ;;  %v660_v45 = vadd.f32 %v659_v61, %v3658_v50  ;;  %v1088_v49 = vadd.f32 %v926_v5, %v656_v42 }
 0x1a2   : > { %v3738_v46 = vpop.f32.mrf.mxu0  ;;  %v3740_v47 = vpop.f32.mrf.mxu1  ;;  %v1376_v7 = vadd.f32 %v3694_v21, %v1095_v55  ;;  %v3884_v40 = vld [vmem:[#allocation9_spill] sm:$0xff] }
 0x1a3   : > { %3876 = vst [vmem:[#allocation15_spill] sm:$0xff] %v3738_v46  ;;  %v1092_v58 = vadd.f32 %v930_v6, %v660_v45  ;;  %v1090_v61 = vadd.f32 %v1003_v9, %v733_v44  ;;  %v1369_v1 = vadd.f32 %v3684_v16, %v1088_v49 }
 0x1a4   : > { %v3742_v37 = vpop.f32.mrf.mxu0  ;;  %v3744_v38 = vpop.f32.mrf.mxu1 }
 0x1a5   : > { %3877 = vst [vmem:[#allocation16_spill] sm:$0xff] %v3742_v37  ;;  %3878 = vst [vmem:[#allocation17_spill] sm:$0xff] %v3744_v38  ;;  %v737_v37 = vadd.f32 %v736_v62, %v3666_v54  ;;  %v662_v38 = vadd.f32 %v661_v63, %v3662_v52  ;;  %v1096_v52 = vadd.f32 %v3676_v11, %v813_v39 }
 0x1a6   : > { %v3753_v35 = vpop.f32.mrf.mxu1  ;;  %v3755_v46 = vpop.f32.mrf.mxu0  ;;  %v1370_v63 = vadd.f32 %v3682_v15, %v1089_v59  ;;  %v1371_v2 = vadd.f32 %v3686_v17, %v1090_v61  ;;  %v1373_v4 = vadd.f32 %v3688_v18, %v1092_v58  ;;  %v1372_v11 = vadd.f32 %v3698_v24, %v1091_v0  ;;  %v3888_v45 = vld [vmem:[#allocation12_spill] sm:$0xff] }
 0x1a7   : > { %3880 = vst [vmem:[#allocation19_spill] sm:$0xff] %v3755_v46  ;;  %v1093_v60 = vadd.f32 %v932_v8, %v662_v38  ;;  %v1368_v46 = vadd.f32 %v1205_v14, %v1087_v57  ;;  %v1094_v54 = vadd.f32 %v3674_v10, %v737_v37  ;;  %v1377_v10 = vadd.f32 %v3696_v22, %v1096_v52 }
 0x1a8   : > { %v3762_v53 = vpop.f32.mrf.mxu1  ;;  %v3764_v50 = vpop.f32.mrf.mxu0  ;;  %v1650_v12 = vadd.f32 %v3700_v25, %v1369_v1  ;;  %v1654_v14 = vadd.f32 %v3702_v26, %v1373_v4  ;;  %v1651_v15 = vadd.f32 %v3704_v27, %v1370_v63  ;;  %v1652_v17 = vadd.f32 %v3708_v29, %v1371_v2  ;;  %v3881_v26 = vld [vmem:[#allocation6_spill] sm:$0xff]  ;;  %v3882_v27 = vld [vmem:[#allocation7_spill] sm:$0xff]  ;;  %v3883_v29 = vld [vmem:[#allocation8_spill] sm:$0xff] }
 0x1a9   : > { %v1649_v3 = vadd.f32 %v1486_v23, %v1368_v46  ;;  %v1375_v5 = vadd.f32 %v3690_v19, %v1094_v54  ;;  %v1374_v6 = vadd.f32 %v3692_v20, %v1093_v60  ;;  %v1658_v21 = vadd.f32 %v3712_v31, %v1377_v10  ;;  %v3889_v48 = vld [vmem:[#allocation13_spill] sm:$0xff] }
 0x1aa   : > { %v2337_v56 = vpop.f32.mrf.mxu1  ;;  %v2414_v62 = vpop.f32.mrf.mxu0  ;;  %v1931_v22 = vadd.f32 %v3720_v36, %v1650_v12  ;;  %v1657_v24 = vadd.f32 %v3714_v32, %v1376_v7  ;;  %v1653_v25 = vadd.f32 %v3716_v33, %v1372_v11  ;;  %v1933_v37 = vadd.f32 %v3882_v27, %v1652_v17  ;;  %v3886_v32 = vld [vmem:[#allocation10_spill] sm:$0xff]  ;;  %v3890_v58 = vld [vmem:[#allocation15_spill] sm:$0xff] }
 0x1ab   : > { %v1930_v13 = vadd.f32 %v1767_v34, %v1649_v3  ;;  %v1655_v16 = vadd.f32 %v3706_v28, %v1374_v6  ;;  %v1656_v20 = vadd.f32 %v3710_v30, %v1375_v5  ;;  %v1932_v34 = vadd.f32 %v3881_v26, %v1651_v15  ;;  %v3885_v30 = vld [vmem:[#allocation14_spill] sm:$0xff]  ;;  %v3798_v36 = vpop.permute.xlu1 %2799  ;;  %v2805_v17 = vpop.permute.xlu0 %2804 }
 0x1ac   : > { %v2339_v8 = vpop.f32.mrf.mxu1  ;;  %v2416_v9 = vpop.f32.mrf.mxu0  ;;  %v1935_v39 = vadd.f32 %v3883_v29, %v1654_v14  ;;  %v2216_v42 = vadd.f32 %v3885_v30, %v1931_v22  ;;  %v1939_v46 = vadd.f32 %v3888_v45, %v1658_v21  ;;  %v1934_v57 = vadd.f32 %v3889_v48, %v1653_v25  ;;  %v3891_v52 = vld [vmem:[#allocation16_spill] sm:$0xff]  ;;  %v3892_v0 = vld [vmem:[#allocation17_spill] sm:$0xff] }
 0x1ad   : > { %v2215_v23 = vadd.f32 %v2052_v43, %v1930_v13  ;;  %v1937_v41 = vadd.f32 %v3884_v40, %v1656_v20  ;;  %v1936_v33 = vadd.f32 %v3886_v32, %v1655_v16  ;;  %v3887_v43 = vld [vmem:[#allocation11_spill] sm:$0xff]  ;;  %v2217_v60 = vadd.f32 %v3740_v47, %v1932_v34 }
 0x1ae   : > { %v2343_v18 = vpop.f32.mrf.mxu1  ;;  %v2420_v19 = vpop.f32.mrf.mxu0  ;;  %v1938_v44 = vadd.f32 %v3887_v43, %v1657_v24  ;;  %v2220_v59 = vadd.f32 %v3890_v58, %v1935_v39  ;;  %v2501_v61 = vadd.f32 %v2339_v8, %v2216_v42  ;;  %v3893_v1 = vld [vmem:[#allocation19_spill] sm:$0xff]  ;;  %v2219_v47 = vadd.f32 %v3764_v50, %v1934_v57 }
 0x1af   : > { %v2500_v31 = vadd.f32 %v2337_v56, %v2215_v23  ;;  %v2221_v55 = vadd.f32 %v3891_v52, %v1936_v33  ;;  %v2218_v56 = vadd.f32 %v3892_v0, %v1933_v37  ;;  %v2222_v63 = vadd.f32 %v3753_v35, %v1937_v41  ;;  %v3894_v35 = vld [vmem:[#allocation18_spill] sm:$0xff] }
 0x1b0   : > { %v2345_v28 = vpop.f32.mrf.mxu1  ;;  %v2422_v38 = vpop.f32.mrf.mxu0  ;;  %v2224_v2 = vadd.f32 %v3893_v1, %v1939_v46  ;;  %v2223_v5 = vadd.f32 %v3762_v53, %v1938_v44  ;;  %v2505_v6 = vadd.f32 %v2343_v18, %v2220_v59  ;;  %v2502_v8 = vadd.f32 %v2414_v62, %v2217_v60 }
 0x1b1   : > { %v2503_v11 = vadd.f32 %v2416_v9, %v2218_v56  ;;  %v2506_v12 = vadd.f32 %v2345_v28, %v2221_v55  ;;  %v2507_v18 = vadd.f32 %v2420_v19, %v2222_v63 }
 0x1b2   : > { %v3173_v51 = vpop.f32.mrf.mxu1  ;;  %v2622_v49 = vpop.f32.mrf.mxu0  ;;  %v2508_v50 = vadd.f32 %v2422_v38, %v2223_v5 }
 0x1b3   : > { %v2785_v54 = vadd.f32 %v2622_v49, %v2500_v31  ;;  %v2509_v62 = vadd.f32 %v3173_v51, %v2224_v2 }
 0x1b4   : > { %v2491_v3 = vpop.f32.mrf.mxu1  ;;  %v2624_v4 = vpop.f32.mrf.mxu0 }
 0x1b5   : > { %v2807_v7 = vadd.f32 %v3798_v36, %v2785_v54  ;;  %v2786_v10 = vadd.f32 %v2624_v4, %v2501_v61  ;;  %v2504_v25 = vadd.f32 %v2491_v3, %v2219_v47 }
 0x1b6   : > { %v2628_v13 = vpop.f32.mrf.mxu0  ;;  %v2699_v14 = vpop.f32.mrf.mxu1 }
 0x1b7   : > { %vm2818_vm10 = vcmp.ge.f32.partialorder %v2807_v7, 0.0  ;;  %v2829_v53 = vmul.f32 %v3894_v35, %v2807_v7  ;;  %v2808_v15 = vadd.f32 %v3798_v36, %v2786_v10  ;;  %v2790_v16 = vadd.f32 %v2628_v13, %v2505_v6 }
 0x1b8   : > { %v2787_v9 = vadd.f32 %v2699_v14, %v2502_v8  ;;  %v2630_v20 = vpop.f32.mrf.mxu0  ;;  %v2701_v21 = vpop.f32.mrf.mxu1 }
 0x1b9   : > { %v2839_v22 = vsel %vm2818_vm10, %v2807_v7, %v2829_v53  ;;  %vm2819_vm12 = vcmp.ge.f32.partialorder %v2808_v15, 0.0  ;;  %v2830_v23 = vmul.f32 %v3894_v35, %v2808_v15  ;;  %v2791_v24 = vadd.f32 %v2630_v20, %v2506_v12 }
 0x1ba   : > { %2849 = vst [vmem:[%s3817_s16] sm:$0xff] %v2839_v22  ;;  %v2809_v26 = vadd.f32 %v3798_v36, %v2787_v9  ;;  %v2788_v34 = vadd.f32 %v2701_v21, %v2503_v11  ;;  %v2812_v27 = vadd.f32 %v2805_v17, %v2790_v16  ;;  %v2705_v37 = vpop.f32.mrf.mxu1  ;;  %v3178_v19 = vpop.f32.mrf.mxu0 }
 0x1bb   : > { %v2840_v28 = vsel %vm2819_vm12, %v2808_v15, %v2830_v23  ;;  %v2813_v38 = vadd.f32 %v2805_v17, %v2791_v24  ;;  %v2792_v29 = vadd.f32 %v2705_v37, %v2507_v18  ;;  %v2794_v39 = vadd.f32 %v3178_v19, %v2509_v62 }
 0x1bc   : > { %2850 = vst [vmem:[%s3817_s16 + $0x8] sm:$0xff] %v2840_v28  ;;  %vm2820_vm13 = vcmp.ge.f32.partialorder %v2809_v26, 0.0  ;;  %v2831_v40 = vmul.f32 %v3894_v35, %v2809_v26  ;;  %v2810_v41 = vadd.f32 %v3798_v36, %v2788_v34  ;;  %vm2823_vm14 = vcmp.ge.f32.partialorder %v2812_v27, 0.0  ;;  %v2707_v32 = vpop.f32.mrf.mxu1  ;;  %v2776_v45 = vpop.f32.mrf.mxu0 }
 0x1bd   : > { %vm2824_vm15 = vcmp.ge.f32.partialorder %v2813_v38, 0.0  ;;  %v2834_v30 = vmul.f32 %v3894_v35, %v2812_v27  ;;  %v2835_v42 = vmul.f32 %v3894_v35, %v2813_v38  ;;  %v2814_v31 = vadd.f32 %v2805_v17, %v2792_v29 }
 0x1be   : > { %v2841_v33 = vsel %vm2820_vm13, %v2809_v26, %v2831_v40  ;;  %vm2821_vm0 = vcmp.ge.f32.partialorder %v2810_v41, 0.0  ;;  %v2832_v43 = vmul.f32 %v3894_v35, %v2810_v41  ;;  %v2816_v44 = vadd.f32 %v2805_v17, %v2794_v39 }
 0x1bf   : > { %2851 = vst [vmem:[%s3817_s16 + $0x10] sm:$0xff] %v2841_v33  ;;  %v2844_v46 = vsel %vm2823_vm14, %v2812_v27, %v2834_v30  ;;  %v2845_v48 = vsel %vm2824_vm15, %v2813_v38, %v2835_v42  ;;  %vm2825_vm1 = vcmp.ge.f32.partialorder %v2814_v31, 0.0  ;;  %v2836_v57 = vmul.f32 %v3894_v35, %v2814_v31 }
 0x1c0   : > { %v2842_v51 = vsel %vm2821_vm0, %v2810_v41, %v2832_v43  ;;  %2855 = vst [vmem:[%s3817_s16 + $0x28] sm:$0xff] %v2844_v46  ;;  %2856 = vst [vmem:[%s3817_s16 + $0x30] sm:$0xff] %v2845_v48  ;;  %vm2827_vm2 = vcmp.ge.f32.partialorder %v2816_v44, 0.0  ;;  %v2838_v49 = vmul.f32 %v3894_v35, %v2816_v44  ;;  %v2793_v58 = vadd.f32 %v2707_v32, %v2508_v50 }
 0x1c1   : > { %2852 = vst [vmem:[%s3817_s16 + $0x18] sm:$0xff] %v2842_v51  ;;  %v2846_v59 = vsel %vm2825_vm1, %v2814_v31, %v2836_v57  ;;  %v2789_v60 = vadd.f32 %v2776_v45, %v2504_v25 }
 0x1c2   : > { %2857 = vst [vmem:[%s3817_s16 + $0x38] sm:$0xff] %v2846_v59  ;;  %v2848_v61 = vsel %vm2827_vm2, %v2816_v44, %v2838_v49  ;;  %v2815_v54 = vadd.f32 %v2805_v17, %v2793_v58 }
 0x1c3   : > { %2859 = vst.msk [vmem:[%s3817_s16 + $0x48] sm:$0xff] %vm2853_vm11, %v2848_v61  ;;  %v2811_v52 = vadd.f32 %v3798_v36, %v2789_v60 }
 0x1c4   : > { %vm2826_vm3 = vcmp.ge.f32.partialorder %v2815_v54, 0.0  ;;  %v2837_v55 = vmul.f32 %v3894_v35, %v2815_v54 }
 0x1c5   : > { %vm2822_vm4 = vcmp.ge.f32.partialorder %v2811_v52, 0.0  ;;  %v2833_v0 = vmul.f32 %v3894_v35, %v2811_v52 }
 0x1c6   : > { %v2847_v56 = vsel %vm2826_vm3, %v2815_v54, %v2837_v55 }
 0x1c7   : > { %2858 = vst [vmem:[%s3817_s16 + $0x40] sm:$0xff] %v2847_v56  ;;  %v2843_v63 = vsel %vm2822_vm4, %v2811_v52, %v2833_v0 }
 0x1c8   : > { %2854 = vst.msk [vmem:[%s3817_s16 + $0x20] sm:$0xff] %vm2853_vm11, %v2843_v63 }
 0x1c9 PF: > { %s22_s27 = sadd.s32 1, %s3292_s27   ;;  %s3895_s25 = smov %s3284_s26 }
 0x1ca   : > { %p19_p0 = scmp.ge.s32.totalorder %s22_s27, 8   ;;  %s3896_s0 = smov %s3288_s4 }
 0x1cb   : > { %s3897_s26 = smov %s3900_s28  ;;  %s3898_s4 = smov %s3904_s29 }
 0x1cc   :  { %21 = sbr.rel (!%p19_p0) target bundleno = 18 (0x12), region = 80 }

</bundles_post_ra>
